<compile_context>
chip_gen: v5e
topology: v5e:2x2
jax: 0.10.0
libtpu: 0.0.40
codegen_flags: <defaults>
</compile_context>

<pallas_src>
import functools

import jax
import jax.numpy as jnp
from jax import lax
from jax.experimental import pallas as pl
from jax.experimental.pallas import tpu as pltpu


# ---------------------------------------------------------------------------
# Tile planning (explicit VMEM budget; must also fit v7x's 64 MiB VMEM).
# ---------------------------------------------------------------------------
_BUDGET = 32 * 1024 * 1024       # target bytes for pipelined blocks + temps
_SLACK = 6 * 1024 * 1024         # headroom: diag/out blocks, spills, internals
_VMEM_LIMIT = 48 * 1024 * 1024   # scoped VMEM limit passed to Mosaic
_TM_CAP = 1024                   # row-tile roofline target
_TK = 512                        # K tile when D is split


def _round_up(x, m):
    return ((x + m - 1) // m) * m


def _largest_row_tile(n_pad, cap):
    """Largest multiple of 8 dividing n_pad that is <= cap (>= 8)."""
    best, t = 8, 8
    lim = min(cap, n_pad)
    while t <= lim:
        if n_pad % t == 0:
            best = t
        t += 8
    return best


def _plan_sum(n, d, in_bytes):
    """Returns (tm, tn, tk, n_pad, d_pad) for the sum path."""
    if n <= 128:
        n_pad = _round_up(n, 8)
        return n_pad, n_pad, d, n_pad, d

    tn = 256 if n >= 256 else 128
    n_pad = _round_up(n, tn)

    # Keep the full feature dim per block (im row block resident across the
    # whole column sweep) whenever a tall (tm=1024) full-D block fits the
    # budget; otherwise split D into _TK-wide chunks (zero padded) and
    # accumulate scores in a VMEM scratch.
    if d <= _TK or (2 * _TM_CAP * d * in_bytes
                    + 2 * d * tn * in_bytes + _SLACK <= _BUDGET):
        tk, d_pad = d, d
    else:
        tk, d_pad = _TK, _round_up(d, _TK)

    st_bytes = 2 * tk * tn * in_bytes            # double-buffered sT block
    per_row = 2 * tk * in_bytes + 4 * tn * 4     # im dbl-buf + f32 temporaries
    if tk != d:
        per_row += tn * 4                        # (tm, tn) f32 scores scratch
    cap = max((_BUDGET - _SLACK - st_bytes) // per_row, 8)
    tm = _largest_row_tile(n_pad, min(cap, _TM_CAP))
    return tm, tn, tk, n_pad, d_pad


def _plan_maxviol(n, d, in_bytes):
    """Returns (tm, tn, n_pad). Full D per block on this (off-default) path."""
    if n <= 128:
        n_pad = _round_up(n, 8)
        return n_pad, n_pad, n_pad
    tn = 256 if n >= 256 else 128
    n_pad = _round_up(n, tn)
    st_bytes = 2 * d * tn * in_bytes
    per_row = 2 * d * in_bytes + 4 * tn * 4
    cap = max((_BUDGET - _SLACK - st_bytes) // per_row, 8)
    # TODO(synk): K-tile the max_violation path too for very large D.
    tm = _largest_row_tile(n_pad, min(cap, _TM_CAP))
    return tm, tn, n_pad


def _pad2d(x, rows, cols):
    pr, pc = rows - x.shape[0], cols - x.shape[1]
    if pr == 0 and pc == 0:
        return x
    return jnp.pad(x, ((0, pr), (0, pc)))


def _pad1d(x, length):
    p = length - x.shape[0]
    return x if p == 0 else jnp.pad(x, (0, p))


# ---------------------------------------------------------------------------
# Sum path (max_violation=False).
# Grid (i, j, k): i = row blocks ("parallel"), j = column blocks, k = K chunks.
# ---------------------------------------------------------------------------
def _contrastive_sum_kernel(im_ref, st_ref, d1_ref, d2_ref, out_ref,
                            acc_ref, scores_ref, *,
                            margin, n_valid, tm, tn, single_k, has_pad):
    i = pl.program_id(0)
    j = pl.program_id(1)
    k = pl.program_id(2)
    ni = pl.num_programs(0)
    nj = pl.num_programs(1)
    nk = pl.num_programs(2)

    # Per-row-block lane accumulator: reset at the start of each row block.
    @pl.when((j == 0) & (k == 0))
    def _():
        acc_ref[...] = jnp.zeros_like(acc_ref)

    # (tm, tn) partial scores on the MXU, f32 accumulate.
    partial = jnp.dot(im_ref[...], st_ref[...],
                      preferred_element_type=jnp.float32)

    if single_k:
        pass  # scores == partial; scores_ref is an unused dummy scratch.
    else:
        @pl.when(k == 0)
        def _():
            scores_ref[...] = partial

        @pl.when(k > 0)
        def _():
            scores_ref[...] += partial

    # Epilogue once per (i, j) tile, after the last K chunk.
    @pl.when(k == nk - 1)
    def _():
        sc = partial if single_k else scores_ref[...]
        t = sc + margin if margin != 0.0 else sc
        cost = (jnp.maximum(t - d1_ref[...], 0.0)
                + jnp.maximum(t - d2_ref[...], 0.0))

        # Hot path: column sums only (VALU + sublane reduce), no masking.
        acc_ref[...] += jnp.sum(cost, axis=0, keepdims=True)

        # Fix-up only on tiles that touch the diagonal or the padded edge:
        # subtract the contributions that must not count.
        row0 = i * tm
        col0 = j * tn
        touches_bad = (row0 < col0 + tn) & (col0 < row0 + tm)
        if has_pad:
            touches_bad = touches_bad | (i == ni - 1) | (j == nj - 1)

        @pl.when(touches_bad)
        def _():
            rid = row0 + lax.broadcasted_iota(jnp.int32, (tm, tn), 0)
            cid = col0 + lax.broadcasted_iota(jnp.int32, (tm, tn), 1)
            bad = rid == cid
            if has_pad:
                bad = bad | (rid >= n_valid) | (cid >= n_valid)
            acc_ref[...] -= jnp.sum(jnp.where(bad, cost, 0.0),
                                    axis=0, keepdims=True)

        # Single cross-lane reduce per row block; lane-dense per-block output
        # (reduced in the wrapper) keeps the "parallel" i axis megacore-safe.
        @pl.when(j == nj - 1)
        def _():
            total = jnp.sum(acc_ref[...])
            out_ref[...] = jnp.zeros(out_ref.shape, jnp.float32) + total


# ---------------------------------------------------------------------------
# max_violation path: tiled, running row-max / col-max scratches.
# ---------------------------------------------------------------------------
def _contrastive_maxviol_kernel(im_ref, st_ref, d1_ref, d2_ref, out_ref,
                                rowmax_ref, colmax_ref, acc_ref, *,
                                margin, n_valid, tm, tn, has_pad):
    i = pl.program_id(0)
    j = pl.program_id(1)
    ni = pl.num_programs(0)
    nj = pl.num_programs(1)

    @pl.when((i == 0) & (j == 0))
    def _():
        acc_ref[0] = jnp.float32(0.0)

    scores = jnp.dot(im_ref[...], st_ref[...],
                     preferred_element_type=jnp.float32)
    t = scores + margin if margin != 0.0 else scores
    cost_s = jnp.maximum(t - d1_ref[...], 0.0)
    cost_im = jnp.maximum(t - d2_ref[...], 0.0)

    # Invalid entries (diagonal and padded rows/cols) are forced to 0; since
    # every valid cost entry is >= 0 and the diagonal itself must be 0, the
    # running maxima initialised at 0 stay exact.
    # TODO(synk): restrict the mask to diagonal / edge tiles only.
    row0 = i * tm
    col0 = j * tn
    rid = row0 + lax.broadcasted_iota(jnp.int32, (tm, tn), 0)
    cid = col0 + lax.broadcasted_iota(jnp.int32, (tm, tn), 1)
    bad = rid == cid
    if has_pad:
        bad = bad | (rid >= n_valid) | (cid >= n_valid)
    cost_s = jnp.where(bad, 0.0, cost_s)
    cost_im = jnp.where(bad, 0.0, cost_im)

    tile_rowmax = jnp.max(cost_s, axis=1, keepdims=True)    # (tm, 1)
    tile_colmax = jnp.max(cost_im, axis=0, keepdims=True)   # (1, tn)

    @pl.when(j == 0)
    def _():
        rowmax_ref[...] = tile_rowmax

    @pl.when(j > 0)
    def _():
        rowmax_ref[...] = jnp.maximum(rowmax_ref[...], tile_rowmax)

    @pl.when(i == 0)
    def _():
        colmax_ref[j] = tile_colmax

    @pl.when(i > 0)
    def _():
        colmax_ref[j] = jnp.maximum(colmax_ref[j], tile_colmax)

    @pl.when(j == nj - 1)
    def _():
        acc_ref[0] += jnp.sum(rowmax_ref[...])

    @pl.when((i == ni - 1) & (j == nj - 1))
    def _():
        out_ref[0, 0] = acc_ref[0] + jnp.sum(colmax_ref[...])


# ---------------------------------------------------------------------------
# Wrapper
# ---------------------------------------------------------------------------
def contrastive_loss(im_g, s_g, *, margin=0.0, max_violation=False,
                     compute_dtype=None):
    """im_g, s_g: (N, D) arrays. Returns a scalar float32 loss.

    compute_dtype: optionally cast matmul inputs (e.g. jnp.bfloat16) to halve
    HBM traffic / VMEM; default keeps the native dtype.
    """
    assert im_g.shape == s_g.shape and im_g.ndim == 2
    n, d = im_g.shape
    margin = float(margin)

    if compute_dtype is not None:
        im_g = im_g.astype(compute_dtype)
        s_g = s_g.astype(compute_dtype)
    in_bytes = im_g.dtype.itemsize

    # diag[i] = scores[i, i] = <im[i], s[i]>: cheap O(N*D) f32 work once.
    diag = jnp.sum(im_g.astype(jnp.float32) * s_g.astype(jnp.float32), axis=-1)

    if max_violation:
        tm, tn, n_pad = _plan_maxviol(n, d, in_bytes)
        ni, nj = n_pad // tm, n_pad // tn
        has_pad = n_pad != n

        im_p = _pad2d(im_g, n_pad, d)
        st_p = _pad2d(s_g, n_pad, d).T                      # one-time transpose
        diag_p = _pad1d(diag, n_pad)
        d1 = diag_p.reshape(n_pad, 1)
        d2 = diag_p.reshape(1, n_pad)

        kernel = functools.partial(
            _contrastive_maxviol_kernel, margin=margin, n_valid=n,
            tm=tm, tn=tn, has_pad=has_pad)
        out = pl.pallas_call(
            kernel,
            out_shape=jax.ShapeDtypeStruct((1, 1), jnp.float32),
            grid_spec=pltpu.PrefetchScalarGridSpec(
                num_scalar_prefetch=0,
                grid=(ni, nj),
                in_specs=[
                    pl.BlockSpec((tm, d), lambda i, j: (i, 0)),
                    pl.BlockSpec((d, tn), lambda i, j: (0, j)),
                    pl.BlockSpec((tm, 1), lambda i, j: (i, 0)),
                    pl.BlockSpec((1, tn), lambda i, j: (0, j)),
                ],
                out_specs=pl.BlockSpec(memory_space=pltpu.MemorySpace.SMEM),
                scratch_shapes=[
                    pltpu.VMEM((tm, 1), jnp.float32),      # running row max
                    pltpu.VMEM((nj, 1, tn), jnp.float32),  # running col max
                    pltpu.SMEM((1,), jnp.float32),         # row-max-sum acc
                ],
            ),
            # Scalar + col-max accumulators carry across both axes.
            # TODO(synk): per-core partial row/col maxima for v7x megacore.
            compiler_params=pltpu.CompilerParams(
                dimension_semantics=("arbitrary", "arbitrary"),
                vmem_limit_bytes=_VMEM_LIMIT),
        )(im_p, st_p, d1, d2)
        return out[0, 0]

    # ----- sum path -----
    tm, tn, tk, n_pad, d_pad = _plan_sum(n, d, in_bytes)
    ni, nj, nk = n_pad // tm, n_pad // tn, d_pad // tk
    single_k = nk == 1
    has_pad = n_pad != n

    im_p = _pad2d(im_g, n_pad, d_pad)
    st_p = _pad2d(s_g, n_pad, d_pad).T                      # one-time transpose
    diag_p = _pad1d(diag, n_pad)
    d1 = diag_p.reshape(n_pad, 1)
    d2 = diag_p.reshape(1, n_pad)

    kernel = functools.partial(
        _contrastive_sum_kernel, margin=margin, n_valid=n,
        tm=tm, tn=tn, single_k=single_k, has_pad=has_pad)
    out = pl.pallas_call(
        kernel,
        out_shape=jax.ShapeDtypeStruct((ni, 8, 128), jnp.float32),
        grid_spec=pltpu.PrefetchScalarGridSpec(
            num_scalar_prefetch=0,
            grid=(ni, nj, nk),
            in_specs=[
                pl.BlockSpec((tm, tk), lambda i, j, k: (i, k)),
                pl.BlockSpec((tk, tn), lambda i, j, k: (k, j)),
                pl.BlockSpec((tm, 1), lambda i, j, k: (i, 0)),
                pl.BlockSpec((1, tn), lambda i, j, k: (0, j)),
            ],
            out_specs=pl.BlockSpec((1, 8, 128), lambda i, j, k: (i, 0, 0)),
            scratch_shapes=[
                pltpu.VMEM((1, tn), jnp.float32),          # per-row-block acc
                pltpu.VMEM((tm, tn) if not single_k else (8, 128),
                           jnp.float32),                   # K-tiled scores acc
            ],
        ),
        compiler_params=pltpu.CompilerParams(
            dimension_semantics=("parallel", "arbitrary", "arbitrary"),
            vmem_limit_bytes=_VMEM_LIMIT),
    )(im_p, st_p, d1, d2)
    # Per-row-block partials -> scalar loss.
    return jnp.sum(out[:, 0, 0])


# ---------------------------------------------------------------------------
# Pure-JAX reference (mirrors the PyTorch module)
# ---------------------------------------------------------------------------
def _reference_loss(im_g, s_g, margin=0.0, max_violation=False):
    im = im_g.astype(jnp.float32)
    s = s_g.astype(jnp.float32)
    scores = im @ s.T
    diag = jnp.sum(im * s, axis=-1)
    d1 = diag[:, None]
    d2 = diag[None, :]
    eye = jnp.eye(scores.shape[0], dtype=bool)
    cost_s = jnp.where(eye, 0.0, jnp.maximum(margin + scores - d1, 0.0))
    cost_im = jnp.where(eye, 0.0, jnp.maximum(margin + scores - d2, 0.0))
    if max_violation:
        return jnp.sum(jnp.max(cost_s, axis=1)) + jnp.sum(jnp.max(cost_im, axis=0))
    return jnp.sum(cost_s) + jnp.sum(cost_im)


if __name__ == "__main__":
    key = jax.random.PRNGKey(0)
    # Tolerances account for MXU default-precision scores vs. XLA's matmul.
    RTOL, ATOL = 5e-3, 5e-2

    def check(name, got, want):
        got = float(got)
        want = float(want)
        assert abs(got - want) <= ATOL + RTOL * abs(want), (name, got, want)

    # 1) Tiny batch (single tile), matching the module's typical usage.
    k1, k2 = jax.random.split(key)
    im = jax.random.normal(k1, (8, 32), dtype=jnp.float32)
    s = jax.random.normal(k2, (8, 32), dtype=jnp.float32)
    check("sum_m0",
          jax.block_until_ready(contrastive_loss(im, s, margin=0.0)),
          _reference_loss(im, s, 0.0))
    check("sum_m02",
          jax.block_until_ready(contrastive_loss(im, s, margin=0.2)),
          _reference_loss(im, s, 0.2))
    check("maxviol_m02",
          jax.block_until_ready(
              contrastive_loss(im, s, margin=0.2, max_violation=True)),
          _reference_loss(im, s, 0.2, True))

    # 2) Ragged batch, multiple row/column tiles: exercises N padding, the
    #    diagonal-tile fix-up, per-row-block partial outputs + parallel axis.
    k3, k4 = jax.random.split(k1)
    im2 = jax.random.normal(k3, (1200, 64), dtype=jnp.float32)
    s2 = jax.random.normal(k4, (1200, 64), dtype=jnp.float32)
    check("sum_ragged",
          jax.block_until_ready(contrastive_loss(im2, s2, margin=0.1)),
          _reference_loss(im2, s2, 0.1))
    check("maxviol_ragged",
          jax.block_until_ready(
              contrastive_loss(im2, s2, margin=0.1, max_violation=True)),
          _reference_loss(im2, s2, 0.1, True))

    # 3) Large feature dim: exercises the K-tiled scores-accumulation path.
    k5, k6 = jax.random.split(k3)
    im3 = jax.random.normal(k5, (256, 3000), dtype=jnp.float32)
    s3 = jax.random.normal(k6, (256, 3000), dtype=jnp.float32)
    check("sum_bigD",
          jax.block_until_ready(contrastive_loss(im3, s3, margin=0.2)),
          _reference_loss(im3, s3, 0.2))

    print("KERNEL_OK")
</pallas_src>

<mosaic_0001>
module attributes {stable_mosaic.version = 11 : i64} {
  func.func @_contrastive_sum_kernel(%arg0: i32, %arg1: i32, %arg2: i32, %arg3: memref<8x32xf32, #tpu.memory_space<vmem>>, %arg4: memref<32x8xf32, #tpu.memory_space<vmem>>, %arg5: memref<8x1xf32, #tpu.memory_space<vmem>>, %arg6: memref<1x8xf32, #tpu.memory_space<vmem>>, %arg7: memref<1x8x128xf32, #tpu.memory_space<vmem>>, %arg8: memref<1x8xf32, #tpu.memory_space<vmem>>, %arg9: memref<8x128xf32, #tpu.memory_space<vmem>>) attributes {dimension_semantics = [#tpu.dimension_semantics<parallel>, #tpu.dimension_semantics<arbitrary>, #tpu.dimension_semantics<arbitrary>], iteration_bounds = array<i64: 1, 1, 1>, scalar_prefetch = 0 : i64, scratch_operands = 2 : i64, tpu.core_type = #tpu.core_type<tc>, window_params = [{transform_indices = @transform_0, window_bounds = array<i64: 8, 32>}, {transform_indices = @transform_1, window_bounds = array<i64: 32, 8>}, {transform_indices = @transform_2, window_bounds = array<i64: 8, 1>}, {transform_indices = @transform_3, window_bounds = array<i64: 1, 8>}, {transform_indices = @transform_4, window_bounds = array<i64: 1, 8, 128>}]} {
    %c0_i32 = arith.constant 0 : i32
    %0 = arith.cmpi eq, %arg1, %c0_i32 : i32
    %c0_i32_0 = arith.constant 0 : i32
    %1 = arith.cmpi eq, %arg2, %c0_i32_0 : i32
    %2 = arith.andi %0, %1 : i1
    %3 = arith.extui %2 : i1 to i32
    %c0_i32_1 = arith.constant 0 : i32
    %4 = arith.cmpi ne, %3, %c0_i32_1 : i32
    scf.if %4 {
      %cst_7 = arith.constant 0.000000e+00 : f32
      %11 = vector.broadcast %cst_7 : f32 to vector<1x8xf32>
      %c0_8 = arith.constant 0 : index
      %c0_9 = arith.constant 0 : index
      %12 = vector.load %arg8[%c0_8, %c0_9] : memref<1x8xf32, #tpu.memory_space<vmem>>, vector<1x8xf32>
      tpu.vector_store %arg8[%c0_8, %c0_9], %11 {strides = array<i32>} : memref<1x8xf32, #tpu.memory_space<vmem>>, vector<1x8xf32>,
    } else {
    }
    %c0 = arith.constant 0 : index
    %c0_2 = arith.constant 0 : index
    %5 = vector.load %arg3[%c0, %c0_2] : memref<8x32xf32, #tpu.memory_space<vmem>>, vector<8x32xf32>
    %c0_3 = arith.constant 0 : index
    %c0_4 = arith.constant 0 : index
    %6 = vector.load %arg4[%c0_3, %c0_4] : memref<32x8xf32, #tpu.memory_space<vmem>>, vector<32x8xf32>
    %cst = arith.constant dense<0.000000e+00> : vector<8x8xf32>
    %7 = tpu.matmul %5, %6, %cst {dimension_numbers = #tpu.dot_dimension_numbers<[1], [0], [0], [1], [0, 0, 1, 1], [], []>} : vector<8x32xf32>, vector<32x8xf32>, vector<8x8xf32> -> vector<8x8xf32>
    %c0_i32_5 = arith.constant 0 : i32
    %8 = arith.cmpi eq, %arg2, %c0_i32_5 : i32
    %9 = arith.extui %8 : i1 to i32
    %c0_i32_6 = arith.constant 0 : i32
    %10 = arith.cmpi ne, %9, %c0_i32_6 : i32
    scf.if %10 {
      %c0_7 = arith.constant 0 : index
      %c0_8 = arith.constant 0 : index
      %11 = vector.load %arg5[%c0_7, %c0_8] : memref<8x1xf32, #tpu.memory_space<vmem>>, vector<8x1xf32>
      %12 = vector.broadcast %11 : vector<8x1xf32> to vector<8x8xf32>
      %13 = arith.subf %7, %12 : vector<8x8xf32>
      %cst_9 = arith.constant 0.000000e+00 : f32
      %14 = vector.broadcast %cst_9 : f32 to vector<8x8xf32>
      %15 = arith.maximumf %13, %14 : vector<8x8xf32>
      %c0_10 = arith.constant 0 : index
      %c0_11 = arith.constant 0 : index
      %16 = vector.load %arg6[%c0_10, %c0_11] : memref<1x8xf32, #tpu.memory_space<vmem>>, vector<1x8xf32>
      %17 = vector.broadcast %16 : vector<1x8xf32> to vector<8x8xf32>
      %18 = arith.subf %7, %17 : vector<8x8xf32>
      %cst_12 = arith.constant 0.000000e+00 : f32
      %19 = vector.broadcast %cst_12 : f32 to vector<8x8xf32>
      %20 = arith.maximumf %18, %19 : vector<8x8xf32>
      %21 = arith.addf %15, %20 : vector<8x8xf32>
      %c0_13 = arith.constant 0 : index
      %c0_14 = arith.constant 0 : index
      %22 = vector.load %arg8[%c0_13, %c0_14] : memref<1x8xf32, #tpu.memory_space<vmem>>, vector<1x8xf32>
      %cst_15 = arith.constant dense<0.000000e+00> : vector<8xf32>
      %23 = vector.multi_reduction <add>, %21, %cst_15 [0] : vector<8x8xf32> to vector<8xf32>
      %24 = vector.shape_cast %23 : vector<8xf32> to vector<1x8xf32>
      %25 = arith.addf %22, %24 : vector<1x8xf32>
      %c0_16 = arith.constant 0 : index
      %c0_17 = arith.constant 0 : index
      %26 = vector.load %arg8[%c0_16, %c0_17] : memref<1x8xf32, #tpu.memory_space<vmem>>, vector<1x8xf32>
      tpu.vector_store %arg8[%c0_16, %c0_17], %25 {strides = array<i32>} : memref<1x8xf32, #tpu.memory_space<vmem>>, vector<1x8xf32>,
      %c8_i32 = arith.constant 8 : i32
      %27 = arith.muli %arg0, %c8_i32 : i32
      %c8_i32_18 = arith.constant 8 : i32
      %28 = arith.muli %arg1, %c8_i32_18 : i32
      %c8_i32_19 = arith.constant 8 : i32
      %29 = arith.addi %28, %c8_i32_19 : i32
      %30 = arith.cmpi slt, %27, %29 : i32
      %c8_i32_20 = arith.constant 8 : i32
      %31 = arith.addi %27, %c8_i32_20 : i32
      %32 = arith.cmpi slt, %28, %31 : i32
      %33 = arith.andi %30, %32 : i1
      %34 = arith.extui %33 : i1 to i32
      %c0_i32_21 = arith.constant 0 : i32
      %35 = arith.cmpi ne, %34, %c0_i32_21 : i32
      scf.if %35 {
        %39 = tpu.iota {dimensions = array<i32: 0>} : vector<8x8xi32>
        %40 = vector.broadcast %27 : i32 to vector<8x8xi32>
        %41 = arith.addi %40, %39 : vector<8x8xi32>
        %42 = tpu.iota {dimensions = array<i32: 1>} : vector<8x8xi32>
        %43 = vector.broadcast %28 : i32 to vector<8x8xi32>
        %44 = arith.addi %43, %42 : vector<8x8xi32>
        %45 = arith.cmpi eq, %41, %44 : vector<8x8xi32>
        %c0_24 = arith.constant 0 : index
        %c0_25 = arith.constant 0 : index
        %46 = vector.load %arg8[%c0_24, %c0_25] : memref<1x8xf32, #tpu.memory_space<vmem>>, vector<1x8xf32>
        %cst_26 = arith.constant 0.000000e+00 : f32
        %47 = vector.broadcast %cst_26 : f32 to vector<8x8xf32>
        %48 = arith.select %45, %21, %47 : vector<8x8xi1>, vector<8x8xf32>
        %cst_27 = arith.constant dense<0.000000e+00> : vector<8xf32>
        %49 = vector.multi_reduction <add>, %48, %cst_27 [0] : vector<8x8xf32> to vector<8xf32>
        %50 = vector.shape_cast %49 : vector<8xf32> to vector<1x8xf32>
        %51 = arith.subf %46, %50 : vector<1x8xf32>
        %c0_28 = arith.constant 0 : index
        %c0_29 = arith.constant 0 : index
        %52 = vector.load %arg8[%c0_28, %c0_29] : memref<1x8xf32, #tpu.memory_space<vmem>>, vector<1x8xf32>
        tpu.vector_store %arg8[%c0_28, %c0_29], %51 {strides = array<i32>} : memref<1x8xf32, #tpu.memory_space<vmem>>, vector<1x8xf32>,
      } else {
      }
      %c0_i32_22 = arith.constant 0 : i32
      %36 = arith.cmpi eq, %arg1, %c0_i32_22 : i32
      %37 = arith.extui %36 : i1 to i32
      %c0_i32_23 = arith.constant 0 : i32
      %38 = arith.cmpi ne, %37, %c0_i32_23 : i32
      scf.if %38 {
        %c0_24 = arith.constant 0 : index
        %c0_25 = arith.constant 0 : index
        %39 = vector.load %arg8[%c0_24, %c0_25] : memref<1x8xf32, #tpu.memory_space<vmem>>, vector<1x8xf32>
        %40 = vector.shape_cast %39 : vector<1x8xf32> to vector<1x1x8xf32>
        %cst_26 = arith.constant dense<0.000000e+00> : vector<1xf32>
        %41 = vector.multi_reduction <add>, %40, %cst_26 [1, 2] : vector<1x1x8xf32> to vector<1xf32>
        %42 = vector.shape_cast %41 : vector<1xf32> to vector<1x1x1xf32>
        %43 = vector.extract %42[0, 0, 0] : f32 from vector<1x1x1xf32>
        %cst_27 = arith.constant 0.000000e+00 : f32
        %44 = vector.broadcast %cst_27 : f32 to vector<1x8x128xf32>
        %45 = vector.broadcast %43 : f32 to vector<1x8x128xf32>
        %46 = arith.addf %44, %45 : vector<1x8x128xf32>
        %c0_28 = arith.constant 0 : index
        %c0_29 = arith.constant 0 : index
        %c0_30 = arith.constant 0 : index
        %47 = vector.load %arg7[%c0_28, %c0_29, %c0_30] : memref<1x8x128xf32, #tpu.memory_space<vmem>>, vector<1x8x128xf32>
        tpu.vector_store %arg7[%c0_28, %c0_29, %c0_30], %46 {strides = array<i32>} : memref<1x8x128xf32, #tpu.memory_space<vmem>>, vector<1x8x128xf32>,
      } else {
      }
    } else {
    }
    return
  }
  func.func @transform_0(%arg0: i32, %arg1: i32, %arg2: i32) -> (i32, i32) {
    %c0_i32 = arith.constant 0 : i32
    return %arg0, %arg2 : i32, i32
  }
  func.func @transform_1(%arg0: i32, %arg1: i32, %arg2: i32) -> (i32, i32) {
    %c0_i32 = arith.constant 0 : i32
    return %arg2, %arg1 : i32, i32
  }
  func.func @transform_2(%arg0: i32, %arg1: i32, %arg2: i32) -> (i32, i32) {
    %c0_i32 = arith.constant 0 : i32
    %c0_i32_0 = arith.constant 0 : i32
    return %arg0, %c0_i32 : i32, i32
  }
  func.func @transform_3(%arg0: i32, %arg1: i32, %arg2: i32) -> (i32, i32) {
    %c0_i32 = arith.constant 0 : i32
    %c0_i32_0 = arith.constant 0 : i32
    return %c0_i32, %arg1 : i32, i32
  }
  func.func @transform_4(%arg0: i32, %arg1: i32, %arg2: i32) -> (i32, i32, i32) {
    %c0_i32 = arith.constant 0 : i32
    %c0_i32_0 = arith.constant 0 : i32
    %c0_i32_1 = arith.constant 0 : i32
    return %arg0, %c0_i32, %c0_i32_0 : i32, i32, i32
  }
}

</mosaic_0001>

<bundles_post_ra>
// kernel: tpu_custom_call.1
= control target key start
LH: loop header
LB: loop body
LE: loop exit
PB: predicated region body
PF: predicated region fallthrough
CT: control target
= control target key end

     0   :  { %v182_v2 = vmov 0   ;;  %s238_s0 = inlined_call_operand.vmem [shape: f32[8,32], index: 0, kind: input, shape index: {}]   ;;  %s239_s1 = inlined_call_operand.vmem [shape: f32[32,8], index: 1, kind: input, shape index: {}]   ;;  %s240_s2 = inlined_call_operand.vmem [shape: f32[8,1], index: 2, kind: input, shape index: {}]   ;;  %s241_s3 = inlined_call_operand.vmem [shape: f32[1,8], index: 3, kind: input, shape index: {}]   ;;  %s242_s4 = inlined_call_operand.hbm [shape: f32[1,8,128], index: 4, kind: output, shape index: {}]  }
   0x1   :  { %v30_v0 = vld [vmem:[%s239_s1 + $0x18] sm:$0xff]  ;;  %v29_v1 = vld [vmem:[%s239_s1 + $0x10] sm:$0xff]  ;;  %154 = vset.pattern.permute.xlu0 %v182_v2  ;;  %v58_v3 = vld [vmem:[%s240_s2] sm:$0xff] }
   0x2   :  { %47 = vmatpush.msra.mxu0 %v30_v0  ;;  %v28_v4 = vld [vmem:[%s239_s1 + $0x8] sm:$0xff]  ;;  %61 = vperm.xlu0 %154, %v58_v3  }
   0x3   :  { %9 = vsyncpa [#allocation5], 0  ;;  %v27_v5 = vld [vmem:[%s239_s1] sm:$0xff]  ;;  %vm31_vm0 = vcmask 261120   ;;  %vm24_vm1 = vcmask 57344   ;;  %v183_v7 = vmov 0.0   ;;  %v95_v8 = vlaneseq }
   0x4   :  { %48 = vmatpush.msra.mxu0 %v29_v1  ;;  %v26_v6 = vld [vmem:[%s238_s0] sm:$0xff]  ;;  %25 = vst.msk [vmem:[#allocation2] sm:$0x1] %vm24_vm1, %v183_v7  ;;  %vm74_vm2 = vcmask 64512   ;;  %s184_s0 = smov [#allocation4]   ;;  %s139_s29 = sshll.u32 %s242_s4, 4  ;;  %s140_s29 = int_to_ptr.hbm [resolvable:$true] %s139_s29 }
   0x5   :  { %v155_v9 = vld [vmem:[%s241_s3] ss:$0 sm:$0xff]  ;;  %v96_v12 = vshrl.u32 %v95_v8, 7  ;;  %v100_v13 = vand.u32 127, %v95_v8  ;;  %s137_s1 = sshll.u32 %s184_s0, 4  ;;  %s138_s1 = int_to_ptr.vmem [resolvable:$true] %s137_s1 }
   0x6   :  { %49 = vmatpush.msra.mxu0 %v28_v4 }
   0x7   :  { %vm103_vm3 = vcmp.eq.s32.totalorder %v96_v12, %v100_v13 }
   0x8   :  { %50 = vmatpush.msra.mxu0 %v27_v5 }
   0x9   :  { %148 = vmatmul.msk.f32.vlgmr.msra.gmra.mxu0 %vm31_vm0, %v26_v6 }
   0xb   :  { %v73_v30 = vld [vmem:[#allocation2] sm:$0x1] }
  0x74   :  { %v62_v10 = vpop.permute.xlu0 %61 }
  0x86   :  { %v52_v11 = vpop.f32.mrf.mxu0 }
  0x87   :  { %v64_v14 = vsub.f32 %v52_v11, %v62_v10  ;;  %v70_v15 = vsub.f32 %v52_v11, %v155_v9 }
  0x89   :  { %v65_v16 = vmax.f32 %v64_v14, 0.0  ;;  %v71_v17 = vmax.f32 %v70_v15, 0.0 }
  0x8b   :  { %v72_v18 = vadd.f32 %v71_v17, %v65_v16 }
  0x8d   :  { %v75_v19 = vsel %vm74_vm2, %v72_v18, 0.0  ;;  %v105_v20 = vsel %vm103_vm3, %v72_v18, 0.0 }
  0x8e   :  { %v76_v21 = vrot.slane %v75_v19, 4  ;;  %v106_v22 = vsel %vm74_vm2, %v105_v20, 0.0 }
  0x8f   :  { %v107_v23 = vrot.slane %v106_v22, 4 }
  0x90   :  { %v77_v24 = vadd.f32 %v76_v21, %v75_v19 }
  0x91   :  { %v108_v26 = vadd.f32 %v107_v23, %v106_v22 }
  0x92   :  { %v78_v25 = vrot.slane %v77_v24, 2 }
  0x93   :  { %v109_v29 = vrot.slane %v108_v26, 2 }
  0x94   :  { %v79_v27 = vadd.f32 %v78_v25, %v77_v24 }
  0x95   :  { %v110_v32 = vadd.f32 %v109_v29, %v108_v26 }
  0x96   :  { %v80_v28 = vrot.slane %v79_v27, 1 }
  0x97   :  { %v111_v34 = vrot.slane %v110_v32, 1 }
  0x98   :  { %v81_v31 = vadd.f32 %v80_v28, %v79_v27 }
  0x99   :  { %v112_v35 = vadd.f32 %v111_v34, %v110_v32 }
  0x9a   :  { %v82_v33 = vadd.f32 %v81_v31, %v73_v30 }
  0x9c   :  { %84 = vst.msk [vmem:[#allocation2] sm:$0x1] %vm24_vm1, %v82_v33 }
  0xa3   :  { %v104_v36 = vld [vmem:[#allocation2] sm:$0x1] }
  0xa4   :  { %v113_v37 = vsub.f32 %v104_v36, %v112_v35 }
  0xa6   :  { %114 = vst.msk [vmem:[#allocation2] sm:$0x1] %vm24_vm1, %v113_v37 }
  0xad   :  { %v118_v38 = vld [vmem:[#allocation2] sm:$0x1] }
  0xae   :  { %v119_v39 = vsel %vm24_vm1, %v118_v38, 0.0 }
  0xaf   :  { %120 = vadd.xlane.f32.xlu0 %v119_v39 }
 0x122   :  { %v121_v40 = vpop.xlane.xlu0 %120 }
 0x123   :  { %v122_v41 = vrot.slane %v121_v40, 4 }
 0x125   :  { %v123_v42 = vadd.f32 %v122_v41, %v121_v40 }
 0x127   :  { %v124_v43 = vrot.slane %v123_v42, 2 }
 0x129   :  { %v125_v44 = vadd.f32 %v124_v43, %v123_v42 }
 0x12b   :  { %v126_v45 = vrot.slane %v125_v44, 1 }
 0x12d   :  { %v127_v46 = vadd.f32 %v126_v45, %v125_v44 }
 0x12f   :  { %149 = vpush %v127_v46 }
 0x160   :  { %s150_s30 = spop %149 }
 0x161   :  { %v129_v47 = vstv %s150_s30 }
 0x162   :  { %131 = vst [vmem:[#allocation4] sm:$0xff] %v129_v47 }
 0x163   :  { %142 = dma.vmem_to_hbm [thread:$0]  %s138_s1, 128, %s140_s29, [#allocation5]  }
 0x164   :  { %180 = dma.done.wait [#allocation5], 128  }
 0x165   :  { %181 = vsyncadd [#allocation5], 4294967168 }
 0x166   :  { %147 = vsyncpa [#allocation5], 1 }

</bundles_post_ra>
